<compile_context>
chip_gen: v7x
topology: tpu7x:2x2x1
jax: 0.10.0
libtpu: 0.0.40
codegen_flags: <defaults>
</compile_context>

<pallas_src>
import functools

import jax
import jax.numpy as jnp
from jax.experimental import pallas as pl
from jax.experimental.pallas import tpu as pltpu


def _focal_loss_kernel(logits_ref, targets_ref, *rest,
                       gamma, use_alpha, total_n, tile_n):
    if use_alpha:
        alpha_ref, out_ref = rest
    else:
        (out_ref,) = rest

    i = pl.program_id(0)

    x = logits_ref[...].astype(jnp.float32)              # (TN, C)
    t = targets_ref[...]                                  # (TN, 1) int32
    tn, c = x.shape

    # --- cross_entropy pieces (max-shifted log-sum-exp) ---
    m = jnp.max(x, axis=-1, keepdims=True)                # XLU lane reduce
    z = x - m                                             # (TN, C)
    ez = jnp.exp(z)                                       # only (TN,C) exp (EUP)
    sumexp = jnp.sum(ez, axis=-1, keepdims=True)          # XLU lane reduce

    # gather z at the target column via masked select (no float one-hot)
    col = jax.lax.broadcasted_iota(jnp.int32, (tn, c), 1)
    z_t = jnp.sum(jnp.where(col == t, z, 0.0), axis=-1, keepdims=True)

    ce = jnp.log(sumexp) - z_t                            # (TN, 1)
    p_t = jnp.exp(-ce)                                     # (TN, 1), EUP, exact

    # --- focal modulation: (1 - p_t) ** gamma * ce ---
    one_minus = jnp.maximum(1.0 - p_t, 0.0)               # clamp fp round-off
    g_f = float(gamma)
    if g_f == int(g_f) and int(g_f) >= 0:
        g = int(g_f)
        if g == 0:
            w = jnp.ones_like(one_minus)
        else:
            w = one_minus
            for _ in range(g - 1):                        # VPU multiplies only
                w = w * one_minus
    else:
        w = one_minus ** jnp.float32(g_f)
    focal = w * ce                                         # (TN, 1)

    if use_alpha:
        focal = alpha_ref[...] * focal                     # pre-gathered column

    # --- ragged last tile: mask rows beyond the true N (select is NaN-safe) ---
    row = jax.lax.broadcasted_iota(jnp.int32, (tn, 1), 0)
    valid = (i * tile_n + row) < total_n
    focal = jnp.where(valid, focal, 0.0)

    # one lane-aligned partial-sum slab per grid step; wrapper reduces
    out_ref[...] = jnp.full(out_ref.shape, jnp.sum(focal), dtype=jnp.float32)


def focal_loss(logits, targets, alpha=None, gamma=2.0, tile_n=None):
    """logits: (N, C) float, targets: (N,) int, alpha: (C,) float or None."""
    n, c = logits.shape
    use_alpha = alpha is not None

    itemsize = jnp.dtype(logits.dtype).itemsize
    sub = 16 if itemsize == 2 else 8                       # bf16 min sublane tile

    # --- padded-VMEM accounting (lane padding to 128 lanes) ---
    padded_c = pl.cdiv(c, 128) * 128
    row_in_bytes = padded_c * itemsize + 128 * 4           # logits + targets cols
    if use_alpha:
        row_in_bytes += 128 * 4                            # alpha_t column
    row_tmp_bytes = 4 * padded_c * 4                       # ~4 live f32 (TN,C) temps
    # 2x-buffered inputs + in-kernel temporaries under a ~24 MiB target
    budget = 24 * 1024 * 1024
    auto_tile = max(sub, (budget // (2 * row_in_bytes + row_tmp_bytes)) // sub * sub)

    if tile_n is None:
        tile_n = auto_tile
    else:
        tile_n = max(sub, (int(tile_n) // sub) * sub)
    if n <= tile_n:
        tile_n = n                                         # full-extent block
    grid_n = pl.cdiv(n, tile_n)

    vmem_limit = 2 * tile_n * row_in_bytes + tile_n * row_tmp_bytes + (2 << 20)
    vmem_limit = int(min(max(vmem_limit, 16 << 20), 64 << 20))

    targets_2d = targets.astype(jnp.int32).reshape(n, 1)
    args = [logits, targets_2d]
    in_specs = [
        pl.BlockSpec((tile_n, c), lambda i: (i, 0)),       # logits tile
        pl.BlockSpec((tile_n, 1), lambda i: (i, 0)),       # targets column
    ]
    if use_alpha:
        alpha_t = alpha.astype(jnp.float32)[targets.astype(jnp.int32)].reshape(n, 1)
        args.append(alpha_t)
        in_specs.append(pl.BlockSpec((tile_n, 1), lambda i: (i, 0)))

    kernel = functools.partial(
        _focal_loss_kernel,
        gamma=float(gamma), use_alpha=use_alpha, total_n=n, tile_n=tile_n)

    partials = pl.pallas_call(
        kernel,
        out_shape=jax.ShapeDtypeStruct((grid_n, 8, 128), jnp.float32),
        grid_spec=pltpu.PrefetchScalarGridSpec(
            num_scalar_prefetch=0,
            grid=(grid_n,),
            in_specs=in_specs,
            out_specs=pl.BlockSpec((1, 8, 128), lambda i: (i, 0, 0)),
        ),
        compiler_params=pltpu.CompilerParams(
            dimension_semantics=("parallel",),             # shard N across TCs
            vmem_limit_bytes=vmem_limit),
    )(*args)

    return jnp.sum(partials[:, 0, 0]) / jnp.float32(n)


def _reference_focal_loss(logits, targets, alpha=None, gamma=2.0):
    """Pure-JAX reference mirroring the PyTorch module (for sanity check)."""
    logp = jax.nn.log_softmax(logits.astype(jnp.float32), axis=-1)
    ce = -jnp.take_along_axis(logp, targets[:, None].astype(jnp.int32), axis=-1)[:, 0]
    p_t = jnp.exp(-ce)
    focal = (1.0 - p_t) ** gamma * ce
    if alpha is not None:
        focal = alpha[targets] * focal
    return jnp.mean(focal)


if __name__ == "__main__":
    key = jax.random.PRNGKey(0)
    k1, k2 = jax.random.split(key)

    # Small case matching the module's typical use (batch of 8, 16 classes).
    N, C = 8, 16
    logits = jax.random.normal(k1, (N, C), dtype=jnp.float32)
    targets = jax.random.randint(k2, (N,), 0, C, dtype=jnp.int32)
    alpha = jnp.linspace(0.5, 1.5, C, dtype=jnp.float32)

    loss = jax.block_until_ready(focal_loss(logits, targets, alpha=alpha, gamma=2.0))
    ref = _reference_focal_loss(logits, targets, alpha=alpha, gamma=2.0)
    assert jnp.allclose(loss, ref, rtol=1e-3, atol=1e-5), (loss, ref)

    # Exercise the gridded, parallel partial-sum path with a ragged last tile.
    k3, k4 = jax.random.split(k1)
    N2, C2 = 1000, 16
    logits2 = jax.random.normal(k3, (N2, C2), dtype=jnp.float32)
    targets2 = jax.random.randint(k4, (N2,), 0, C2, dtype=jnp.int32)
    loss2 = jax.block_until_ready(
        focal_loss(logits2, targets2, alpha=None, gamma=2.0, tile_n=256))
    ref2 = _reference_focal_loss(logits2, targets2, alpha=None, gamma=2.0)
    assert jnp.allclose(loss2, ref2, rtol=1e-3, atol=1e-5), (loss2, ref2)

    print("KERNEL_OK")
</pallas_src>

<mosaic_0001>
module attributes {stable_mosaic.version = 11 : i64} {
  func.func @_focal_loss_kernel(%arg0: i32, %arg1: memref<8x16xf32, #tpu.memory_space<vmem>>, %arg2: memref<8x1xi32, #tpu.memory_space<vmem>>, %arg3: memref<8x1xf32, #tpu.memory_space<vmem>>, %arg4: memref<1x8x128xf32, #tpu.memory_space<vmem>>) attributes {dimension_semantics = [#tpu.dimension_semantics<parallel>], iteration_bounds = array<i64: 1>, scalar_prefetch = 0 : i64, scratch_operands = 0 : i64, tpu.core_type = #tpu.core_type<tc>, window_params = [{transform_indices = @transform_0, window_bounds = array<i64: 8, 16>}, {transform_indices = @transform_1, window_bounds = array<i64: 8, 1>}, {transform_indices = @transform_2, window_bounds = array<i64: 8, 1>}, {transform_indices = @transform_3, window_bounds = array<i64: 1, 8, 128>}]} {
    %c0 = arith.constant 0 : index
    %c0_0 = arith.constant 0 : index
    %0 = vector.load %arg1[%c0, %c0_0] : memref<8x16xf32, #tpu.memory_space<vmem>>, vector<8x16xf32>
    %c0_1 = arith.constant 0 : index
    %c0_2 = arith.constant 0 : index
    %1 = vector.load %arg2[%c0_1, %c0_2] : memref<8x1xi32, #tpu.memory_space<vmem>>, vector<8x1xi32>
    %cst = arith.constant dense<0xFF800000> : vector<8xf32>
    %2 = vector.multi_reduction <maximumf>, %0, %cst [1] : vector<8x16xf32> to vector<8xf32>
    %3 = vector.shape_cast %2 : vector<8xf32> to vector<8x1xf32>
    %4 = vector.broadcast %3 : vector<8x1xf32> to vector<8x16xf32>
    %5 = arith.subf %0, %4 : vector<8x16xf32>
    %6 = math.exp %5 : vector<8x16xf32>
    %cst_3 = arith.constant dense<0.000000e+00> : vector<8xf32>
    %7 = vector.multi_reduction <add>, %6, %cst_3 [1] : vector<8x16xf32> to vector<8xf32>
    %8 = vector.shape_cast %7 : vector<8xf32> to vector<8x1xf32>
    %9 = tpu.iota {dimensions = array<i32: 1>} : vector<8x16xi32>
    %10 = vector.broadcast %1 : vector<8x1xi32> to vector<8x16xi32>
    %11 = arith.cmpi eq, %9, %10 : vector<8x16xi32>
    %cst_4 = arith.constant 0.000000e+00 : f32
    %12 = vector.broadcast %cst_4 : f32 to vector<8x16xf32>
    %13 = arith.select %11, %5, %12 : vector<8x16xi1>, vector<8x16xf32>
    %cst_5 = arith.constant dense<0.000000e+00> : vector<8xf32>
    %14 = vector.multi_reduction <add>, %13, %cst_5 [1] : vector<8x16xf32> to vector<8xf32>
    %15 = vector.shape_cast %14 : vector<8xf32> to vector<8x1xf32>
    %16 = math.log %8 : vector<8x1xf32>
    %17 = arith.subf %16, %15 : vector<8x1xf32>
    %cst_6 = arith.constant 0.000000e+00 : f32
    %18 = vector.broadcast %cst_6 : f32 to vector<8x1xf32>
    %19 = arith.subf %18, %17 : vector<8x1xf32>
    %20 = math.exp %19 : vector<8x1xf32>
    %cst_7 = arith.constant 1.000000e+00 : f32
    %21 = vector.broadcast %cst_7 : f32 to vector<8x1xf32>
    %22 = arith.subf %21, %20 : vector<8x1xf32>
    %cst_8 = arith.constant 0.000000e+00 : f32
    %23 = vector.broadcast %cst_8 : f32 to vector<8x1xf32>
    %24 = arith.maximumf %22, %23 : vector<8x1xf32>
    %25 = arith.mulf %24, %24 : vector<8x1xf32>
    %26 = arith.mulf %25, %17 : vector<8x1xf32>
    %c0_9 = arith.constant 0 : index
    %c0_10 = arith.constant 0 : index
    %27 = vector.load %arg3[%c0_9, %c0_10] : memref<8x1xf32, #tpu.memory_space<vmem>>, vector<8x1xf32>
    %28 = arith.mulf %27, %26 : vector<8x1xf32>
    %29 = tpu.iota {dimensions = array<i32: 0>} : vector<8x1xi32>
    %c8_i32 = arith.constant 8 : i32
    %30 = arith.muli %arg0, %c8_i32 : i32
    %31 = vector.broadcast %30 : i32 to vector<8x1xi32>
    %32 = arith.addi %31, %29 : vector<8x1xi32>
    %c8_i32_11 = arith.constant 8 : i32
    %33 = vector.broadcast %c8_i32_11 : i32 to vector<8x1xi32>
    %34 = arith.cmpi slt, %32, %33 : vector<8x1xi32>
    %cst_12 = arith.constant 0.000000e+00 : f32
    %35 = vector.broadcast %cst_12 : f32 to vector<8x1xf32>
    %36 = arith.select %34, %28, %35 : vector<8x1xi1>, vector<8x1xf32>
    %37 = vector.shape_cast %36 : vector<8x1xf32> to vector<1x8x1xf32>
    %cst_13 = arith.constant dense<0.000000e+00> : vector<1xf32>
    %38 = vector.multi_reduction <add>, %37, %cst_13 [1, 2] : vector<1x8x1xf32> to vector<1xf32>
    %39 = vector.shape_cast %38 : vector<1xf32> to vector<1x1x1xf32>
    %40 = vector.extract %39[0, 0, 0] : f32 from vector<1x1x1xf32>
    %41 = vector.broadcast %40 : f32 to vector<1x8x128xf32>
    %c0_14 = arith.constant 0 : index
    %c0_15 = arith.constant 0 : index
    %c0_16 = arith.constant 0 : index
    %42 = vector.load %arg4[%c0_14, %c0_15, %c0_16] : memref<1x8x128xf32, #tpu.memory_space<vmem>>, vector<1x8x128xf32>
    tpu.vector_store %arg4[%c0_14, %c0_15, %c0_16], %41 {strides = array<i32>} : memref<1x8x128xf32, #tpu.memory_space<vmem>>, vector<1x8x128xf32>,
    return
  }
  func.func @transform_0(%arg0: i32) -> (i32, i32) {
    %c0_i32 = arith.constant 0 : i32
    %c0_i32_0 = arith.constant 0 : i32
    return %arg0, %c0_i32 : i32, i32
  }
  func.func @transform_1(%arg0: i32) -> (i32, i32) {
    %c0_i32 = arith.constant 0 : i32
    %c0_i32_0 = arith.constant 0 : i32
    return %arg0, %c0_i32 : i32, i32
  }
  func.func @transform_2(%arg0: i32) -> (i32, i32) {
    %c0_i32 = arith.constant 0 : i32
    %c0_i32_0 = arith.constant 0 : i32
    return %arg0, %c0_i32 : i32, i32
  }
  func.func @transform_3(%arg0: i32) -> (i32, i32, i32) {
    %c0_i32 = arith.constant 0 : i32
    %c0_i32_0 = arith.constant 0 : i32
    %c0_i32_1 = arith.constant 0 : i32
    return %arg0, %c0_i32, %c0_i32_0 : i32, i32, i32
  }
}

</mosaic_0001>

<bundles_post_ra>
// kernel: tpu_custom_call.1
= control target key start
LH: loop header
LB: loop body
LE: loop exit
PB: predicated region body
PF: predicated region fallthrough
CT: control target
= control target key end

     0   :  { %vm17_vm0 = vcmask 130048   ;;  %s164_s0 = inlined_call_operand.vmem [shape: f32[8,16], index: 0, kind: input, shape index: {}]   ;;  %s165_s1 = inlined_call_operand.vmem [shape: s32[8,1], index: 1, kind: input, shape index: {}]   ;;  %s166_s2 = inlined_call_operand.vmem [shape: f32[8,1], index: 2, kind: input, shape index: {}]   ;;  %s167_s3 = inlined_call_operand.hbm [shape: f32[1,8,128], index: 3, kind: output, shape index: {}]  }
   0x1   :  { %v15_v0 = vld [vmem:[%s164_s0] sm:$0xff] }
   0x2   :  { %8 = vsyncpa [#allocation3], 0  ;;  %v18_v1 = vsel %vm17_vm0, %v15_v0, -inf  ;;  %v118_v2 = vmov 0   ;;  %v16_v3 = vld [vmem:[%s165_s1] sm:$0xff]  ;;  %v27_v7 = vlaneseq  ;;  %vm56_vm2 = vcmask 7168  }
   0x3   :  { %87 = vset.pattern.permute.xlu0 %v118_v2  ;;  %v47_v25 = vld [vmem:[%s166_s2] sm:$0xff]  ;;  %s119_s16 = smov [#allocation2]  }
   0x4   :  { %19 = vmax.xlane.f32.xlu0 %v18_v1  ;;  %v28_v8 = vand.u32 127, %v27_v7  ;;  %s75_s17 = sshll.u32 %s119_s16, 4  ;;  %s76_s17 = int_to_ptr.vmem [resolvable:$true] %s75_s17 }
   0x5   :  { %s94_s2 = scalar_lea.vmem %s76_s17, 128  ;;  %p99_p1 = scmp.lt.s32.totalorder %s76_s17, %s76_s17 }
   0x6   :  { %p95_p0 = scmp.ne.s32.totalorder %s76_s17, %s94_s2  ;;  %p100_p2 = scmp.lt.s32.totalorder %s94_s2, %s94_s2 }
   0x8   :  { %p101_p3 = por %p100_p2, %p99_p1 }
   0xa   :  { %p102_p4 = pnand %p101_p3, %p95_p0 }
  0x1a   :  { %30 = vperm.xlu0 %87, %v16_v3  }
  0x91   :  { %v20_v4 = vpop.xlane.xlu0 %19 }
  0x92   :  { %v21_v5 = vsub.f32 %v15_v0, %v20_v4 }
  0x94   :  { %v22_v6 = vmul.f32 1.442695, %v21_v5 }
  0x96   :  { %88 = vpow2.f32 %v22_v6 }
  0x99   :  { %v31_v9 = vpop.permute.xlu0 %30 }
  0x9a   :  { %vm32_vm1 = vcmp.eq.s32.totalorder %v28_v8, %v31_v9 }
  0x9b   :  { %v33_v12 = vsel %vm32_vm1, %v21_v5, 0.0 }
  0x9c   :  { %v34_v13 = vsel %vm17_vm0, %v33_v12, 0.0 }
  0xa0   :  { %v89_v10 = vpop.eup %88 }
  0xa1   :  { %v24_v11 = vsel %vm17_vm0, %v89_v10, 0.0 }
  0xa2   :  { %25 = vadd.xlane.f32.xlu1 %v24_v11 }
  0xa6   :  { %35 = vadd.xlane.f32.xlu1 %v34_v13 }
 0x12f   :  { %v26_v14 = vpop.xlane.xlu1 %25 }
 0x130   :  { %90 = vlog2.f32 %v26_v14 }
 0x133   :  { %v36_v17 = vpop.xlane.xlu1 %35 }
 0x13a   :  { %v91_v15 = vpop.eup %90 }
 0x13b   :  { %v38_v16 = vmul.f32 0.6931472, %v91_v15 }
 0x13d   :  { %v39_v18 = vsub.f32 %v38_v16, %v36_v17 }
 0x13f   :  { %v40_v19 = vsub.f32 0.0, %v39_v18 }
 0x141   :  { %v41_v20 = vmul.f32 1.442695, %v40_v19 }
 0x143   :  { %92 = vpow2.f32 %v41_v20 }
 0x14d   :  { %v93_v21 = vpop.eup %92 }
 0x14e   :  { %v43_v22 = vsub.f32 1.0, %v93_v21 }
 0x150   :  { %v44_v23 = vmax.f32 %v43_v22, 0.0 }
 0x152   :  { %v45_v24 = vmul.f32 %v44_v23, %v44_v23 }
 0x154   :  { %v46_v26 = vmul.f32 %v45_v24, %v39_v18 }
 0x156   :  { %v48_v27 = vmul.f32 %v47_v25, %v46_v26 }
 0x158   :  { %v57_v28 = vsel %vm56_vm2, %v48_v27, 0.0 }
 0x159   :  { %58 = vadd.xlane.f32.xlu1 %v57_v28 }
 0x1e6   :  { %v59_v29 = vpop.xlane.xlu1 %58 }
 0x1e7   :  { %v60_v30 = vrot.slane %v59_v29, 4 }
 0x1e9   :  { %v61_v31 = vadd.f32 %v60_v30, %v59_v29 }
 0x1eb   :  { %v62_v32 = vrot.slane %v61_v31, 2 }
 0x1ed   :  { %v63_v33 = vadd.f32 %v62_v32, %v61_v31 }
 0x1ef   :  { %v64_v34 = vrot.slane %v63_v33, 1 }
 0x1f1   :  { %v65_v35 = vadd.f32 %v64_v34, %v63_v33 }
 0x1f3   :  { %83 = vpush %v65_v35 }
 0x224   :  { %s84_s18 = spop %83 }
 0x225   :  { %v67_v36 = vstv %s84_s18 }
 0x226   :  { %68 = vst [vmem:[#allocation2] sm:$0xff] %v67_v36 }
 0x227   :  { %105 = shalt.err (!%p102_p4)
}
 0x228   :  { %s106_s21 = scalar_lea.hbm %s167_s3, 128 }
 0x229   :  { %p107_p5 = scmp.ne.s32.totalorder %s167_s3, %s106_s21  ;;  %p110_p6 = scmp.lt.u32.totalorder %s106_s21, %s167_s3 }
 0x22b   :  { %p112_p7 = pnand %p110_p6, %p107_p5 }
 0x22d   :  { %115 = shalt.err (!%p112_p7)
}
 0x22e   :  { %78 = dma.vmem_to_hbm [thread:$0]  %s76_s17, 128, %s167_s3, [#allocation3]  }
 0x22f   :  { %116 = dma.done.wait [#allocation3], 128  }
 0x230   :  { %117 = vsyncadd [#allocation3], 4294967168 }
 0x231   :  { %82 = vsyncpa [#allocation3], 1 }

</bundles_post_ra>
